<compile_context>
chip_gen: v5e
topology: v5e:2x2
jax: 0.10.0
libtpu: 0.0.40
codegen_flags: <defaults>
</compile_context>

<pallas_src>
import functools

import jax
import jax.numpy as jnp
import numpy as np
from jax.experimental import pallas as pl
from jax.experimental.pallas import tpu as pltpu


def _gwc_volume_kernel(ref_ref, tgt_ref, wcol_ref, out_ref, *, maxdisp):
    """Group-wise correlation volume for one (batch, group) tile.

    ref_ref:  (1, 1, Cg, HW)  reference features for this group (lane dim = HW)
    tgt_ref:  (1, 1, Cg, HW)  target features for this group
    wcol_ref: (1, HW)         int32 column coordinate (w) of each flat pixel
    out_ref:  (1, 1, D, HW)   out[d, hw] = sum_cg ref[cg, hw] * tgt[cg, hw - d]
    """
    r = ref_ref[0, 0]          # (Cg, HW) f32, loaded once, resident for all disparities
    t = tgt_ref[0, 0]          # (Cg, HW) f32
    wcol = wcol_ref[...]       # (1, HW)  i32

    for d in range(maxdisp):   # static unrolled loop, D is small
        # Shift the target right by d pixels along W via a lane roll of the flat HW
        # axis (XLU, leaves VPU free). Positions that wrapped across a row boundary
        # all have w < d and are zeroed by the mask below.
        shifted = pltpu.roll(t, shift=d, axis=1) if d > 0 else t
        corr = jnp.sum(r * shifted, axis=0, keepdims=True)        # (1, HW)
        corr = jnp.where(wcol >= d, corr, 0.0)                    # zero where w - d < 0
        out_ref[0, 0, pl.ds(d, 1), :] = corr


def build_gwc_volume_unfold(refimg_fea, targetimg_fea, maxdisp, num_groups):
    """JAX/Pallas equivalent of Build_gwc_volume_unfold.forward (NCHW in, (B,G,D,H,W) out)."""
    B, C, H, W = refimg_fea.shape
    assert C % num_groups == 0, "channels must be divisible by num_groups"
    G = num_groups
    Cg = C // G
    HW = H * W
    D = maxdisp

    ref4 = refimg_fea.reshape(B, G, Cg, HW).astype(jnp.float32)
    tgt4 = targetimg_fea.reshape(B, G, Cg, HW).astype(jnp.float32)
    # Column coordinate of each flat pixel (computed once in plain JAX; avoids an
    # in-kernel integer modulo).
    wcol = jnp.tile(jnp.arange(W, dtype=jnp.int32), H).reshape(1, HW)

    flops = 2 * B * G * Cg * D * HW                          # mul + add per tap
    bytes_accessed = 4 * (2 * B * C * HW + B * G * D * HW)   # ref + tgt + volume
    cost = pl.CostEstimate(flops=flops, transcendentals=0,
                           bytes_accessed=bytes_accessed)

    out = pl.pallas_call(
        functools.partial(_gwc_volume_kernel, maxdisp=D),
        out_shape=jax.ShapeDtypeStruct((B, G, D, HW), jnp.float32),
        grid=(B, G),
        in_specs=[
            pl.BlockSpec((1, 1, Cg, HW), lambda b, g: (b, g, 0, 0)),
            pl.BlockSpec((1, 1, Cg, HW), lambda b, g: (b, g, 0, 0)),
            pl.BlockSpec((1, HW), lambda b, g: (0, 0)),
        ],
        out_specs=pl.BlockSpec((1, 1, D, HW), lambda b, g: (b, g, 0, 0)),
        compiler_params=pltpu.CompilerParams(
            dimension_semantics=("parallel", "parallel")),
        cost_estimate=cost,
    )(ref4, tgt4, wcol)

    return out.reshape(B, G, D, H, W)


def _ref_gwc_volume_unfold(refimg_fea, targetimg_fea, maxdisp, num_groups):
    """Pure-JAX transliteration of the PyTorch module (ZeroPad2d + Unfold + flip)."""
    B, C, H, W = refimg_fea.shape
    G, Cg = num_groups, C // num_groups
    tpad = jnp.pad(targetimg_fea, ((0, 0), (0, 0), (0, 0), (maxdisp - 1, 0)))
    # nn.Unfold((1, maxdisp)): window element kw=d at block (h, w) reads tpad[..., w+d]
    slabs = [tpad[:, :, :, d:d + W] for d in range(maxdisp)]        # each (B, C, H, W)
    unfolded = jnp.stack(slabs, axis=2).reshape(B, G, Cg, maxdisp, H, W)
    ref = refimg_fea.reshape(B, G, Cg, 1, H, W)
    vol = jnp.sum(ref * unfolded, axis=2)                           # (B, G, D, H, W)
    return vol[:, :, ::-1, :, :]                                    # torch.flip(volume, [2])


if __name__ == "__main__":
    key = jax.random.PRNGKey(0)
    kr, kt = jax.random.split(key)

    B, C, H, W = 2, 8, 16, 16
    maxdisp, num_groups = 8, 4

    refimg = jax.random.normal(kr, (B, C, H, W), jnp.float32)
    tgtimg = jax.random.normal(kt, (B, C, H, W), jnp.float32)

    vol = build_gwc_volume_unfold(refimg, tgtimg, maxdisp, num_groups)
    vol = jax.block_until_ready(vol)
    assert vol.shape == (B, num_groups, maxdisp, H, W)
    assert vol.dtype == jnp.float32

    ref = _ref_gwc_volume_unfold(refimg, tgtimg, maxdisp, num_groups)
    err = float(jnp.max(jnp.abs(vol - ref)))
    if not np.isfinite(err) or err > 1e-4:
        raise AssertionError(f"mismatch vs reference: max abs err {err}")

    print("KERNEL_OK")
</pallas_src>

<mosaic_0001>
module attributes {stable_mosaic.version = 11 : i64} {
  func.func @_gwc_volume_kernel(%arg0: i32, %arg1: i32, %arg2: memref<1x1x2x256xf32, #tpu.memory_space<vmem>>, %arg3: memref<1x1x2x256xf32, #tpu.memory_space<vmem>>, %arg4: memref<1x256xi32, #tpu.memory_space<vmem>>, %arg5: memref<1x1x8x256xf32, #tpu.memory_space<vmem>>) attributes {dimension_semantics = [#tpu.dimension_semantics<parallel>, #tpu.dimension_semantics<parallel>], iteration_bounds = array<i64: 2, 4>, scalar_prefetch = 0 : i64, scratch_operands = 0 : i64, tpu.core_type = #tpu.core_type<tc>, window_params = [{transform_indices = @transform_0, window_bounds = array<i64: 1, 1, 2, 256>}, {transform_indices = @transform_1, window_bounds = array<i64: 1, 1, 2, 256>}, {pipeline_mode = #tpu.pipeline_mode<synchronous>, transform_indices = @transform_2, window_bounds = array<i64: 1, 256>}, {transform_indices = @transform_3, window_bounds = array<i64: 1, 1, 8, 256>}]} {
    %c0 = arith.constant 0 : index
    %c0_0 = arith.constant 0 : index
    %c0_1 = arith.constant 0 : index
    %c0_2 = arith.constant 0 : index
    %0 = vector.load %arg2[%c0, %c0_0, %c0_1, %c0_2] : memref<1x1x2x256xf32, #tpu.memory_space<vmem>>, vector<1x1x2x256xf32>
    %1 = vector.shape_cast %0 : vector<1x1x2x256xf32> to vector<2x256xf32>
    %c0_3 = arith.constant 0 : index
    %c0_4 = arith.constant 0 : index
    %c0_5 = arith.constant 0 : index
    %c0_6 = arith.constant 0 : index
    %2 = vector.load %arg3[%c0_3, %c0_4, %c0_5, %c0_6] : memref<1x1x2x256xf32, #tpu.memory_space<vmem>>, vector<1x1x2x256xf32>
    %3 = vector.shape_cast %2 : vector<1x1x2x256xf32> to vector<2x256xf32>
    %c0_7 = arith.constant 0 : index
    %c0_8 = arith.constant 0 : index
    %4 = vector.load %arg4[%c0_7, %c0_8] : memref<1x256xi32, #tpu.memory_space<vmem>>, vector<1x256xi32>
    %5 = arith.mulf %1, %3 : vector<2x256xf32>
    %cst = arith.constant dense<0.000000e+00> : vector<256xf32>
    %6 = vector.multi_reduction <add>, %5, %cst [0] : vector<2x256xf32> to vector<256xf32>
    %7 = vector.shape_cast %6 : vector<256xf32> to vector<1x256xf32>
    %c0_i32 = arith.constant 0 : i32
    %8 = vector.broadcast %c0_i32 : i32 to vector<1x256xi32>
    %9 = arith.cmpi sge, %4, %8 : vector<1x256xi32>
    %cst_9 = arith.constant 0.000000e+00 : f32
    %10 = vector.broadcast %cst_9 : f32 to vector<1x256xf32>
    %11 = arith.select %9, %7, %10 : vector<1x256xi1>, vector<1x256xf32>
    %c0_10 = arith.constant 0 : index
    %c0_11 = arith.constant 0 : index
    %c0_12 = arith.constant 0 : index
    %c0_13 = arith.constant 0 : index
    %12 = vector.load %arg5[%c0_10, %c0_11, %c0_12, %c0_13] : memref<1x1x8x256xf32, #tpu.memory_space<vmem>>, vector<1x1x1x256xf32>
    %13 = vector.shape_cast %12 : vector<1x1x1x256xf32> to vector<1x256xf32>
    %14 = vector.shape_cast %11 : vector<1x256xf32> to vector<1x1x1x256xf32>
    tpu.vector_store %arg5[%c0_10, %c0_11, %c0_12, %c0_13], %14 {strides = array<i32>} : memref<1x1x8x256xf32, #tpu.memory_space<vmem>>, vector<1x1x1x256xf32>,
    %c1_i32 = arith.constant 1 : i32
    %15 = tpu.dynamic_rotate %3 by %c1_i32 dim 1 : vector<2x256xf32>, i32 -> vector<2x256xf32>
    %16 = arith.mulf %1, %15 : vector<2x256xf32>
    %cst_14 = arith.constant dense<0.000000e+00> : vector<256xf32>
    %17 = vector.multi_reduction <add>, %16, %cst_14 [0] : vector<2x256xf32> to vector<256xf32>
    %18 = vector.shape_cast %17 : vector<256xf32> to vector<1x256xf32>
    %c1_i32_15 = arith.constant 1 : i32
    %19 = vector.broadcast %c1_i32_15 : i32 to vector<1x256xi32>
    %20 = arith.cmpi sge, %4, %19 : vector<1x256xi32>
    %cst_16 = arith.constant 0.000000e+00 : f32
    %21 = vector.broadcast %cst_16 : f32 to vector<1x256xf32>
    %22 = arith.select %20, %18, %21 : vector<1x256xi1>, vector<1x256xf32>
    %c0_17 = arith.constant 0 : index
    %c0_18 = arith.constant 0 : index
    %c1 = arith.constant 1 : index
    %c0_19 = arith.constant 0 : index
    %23 = vector.load %arg5[%c0_17, %c0_18, %c1, %c0_19] : memref<1x1x8x256xf32, #tpu.memory_space<vmem>>, vector<1x1x1x256xf32>
    %24 = vector.shape_cast %23 : vector<1x1x1x256xf32> to vector<1x256xf32>
    %25 = vector.shape_cast %22 : vector<1x256xf32> to vector<1x1x1x256xf32>
    tpu.vector_store %arg5[%c0_17, %c0_18, %c1, %c0_19], %25 {strides = array<i32>} : memref<1x1x8x256xf32, #tpu.memory_space<vmem>>, vector<1x1x1x256xf32>,
    %c2_i32 = arith.constant 2 : i32
    %26 = tpu.dynamic_rotate %3 by %c2_i32 dim 1 : vector<2x256xf32>, i32 -> vector<2x256xf32>
    %27 = arith.mulf %1, %26 : vector<2x256xf32>
    %cst_20 = arith.constant dense<0.000000e+00> : vector<256xf32>
    %28 = vector.multi_reduction <add>, %27, %cst_20 [0] : vector<2x256xf32> to vector<256xf32>
    %29 = vector.shape_cast %28 : vector<256xf32> to vector<1x256xf32>
    %c2_i32_21 = arith.constant 2 : i32
    %30 = vector.broadcast %c2_i32_21 : i32 to vector<1x256xi32>
    %31 = arith.cmpi sge, %4, %30 : vector<1x256xi32>
    %cst_22 = arith.constant 0.000000e+00 : f32
    %32 = vector.broadcast %cst_22 : f32 to vector<1x256xf32>
    %33 = arith.select %31, %29, %32 : vector<1x256xi1>, vector<1x256xf32>
    %c0_23 = arith.constant 0 : index
    %c0_24 = arith.constant 0 : index
    %c2 = arith.constant 2 : index
    %c0_25 = arith.constant 0 : index
    %34 = vector.load %arg5[%c0_23, %c0_24, %c2, %c0_25] : memref<1x1x8x256xf32, #tpu.memory_space<vmem>>, vector<1x1x1x256xf32>
    %35 = vector.shape_cast %34 : vector<1x1x1x256xf32> to vector<1x256xf32>
    %36 = vector.shape_cast %33 : vector<1x256xf32> to vector<1x1x1x256xf32>
    tpu.vector_store %arg5[%c0_23, %c0_24, %c2, %c0_25], %36 {strides = array<i32>} : memref<1x1x8x256xf32, #tpu.memory_space<vmem>>, vector<1x1x1x256xf32>,
    %c3_i32 = arith.constant 3 : i32
    %37 = tpu.dynamic_rotate %3 by %c3_i32 dim 1 : vector<2x256xf32>, i32 -> vector<2x256xf32>
    %38 = arith.mulf %1, %37 : vector<2x256xf32>
    %cst_26 = arith.constant dense<0.000000e+00> : vector<256xf32>
    %39 = vector.multi_reduction <add>, %38, %cst_26 [0] : vector<2x256xf32> to vector<256xf32>
    %40 = vector.shape_cast %39 : vector<256xf32> to vector<1x256xf32>
    %c3_i32_27 = arith.constant 3 : i32
    %41 = vector.broadcast %c3_i32_27 : i32 to vector<1x256xi32>
    %42 = arith.cmpi sge, %4, %41 : vector<1x256xi32>
    %cst_28 = arith.constant 0.000000e+00 : f32
    %43 = vector.broadcast %cst_28 : f32 to vector<1x256xf32>
    %44 = arith.select %42, %40, %43 : vector<1x256xi1>, vector<1x256xf32>
    %c0_29 = arith.constant 0 : index
    %c0_30 = arith.constant 0 : index
    %c3 = arith.constant 3 : index
    %c0_31 = arith.constant 0 : index
    %45 = vector.load %arg5[%c0_29, %c0_30, %c3, %c0_31] : memref<1x1x8x256xf32, #tpu.memory_space<vmem>>, vector<1x1x1x256xf32>
    %46 = vector.shape_cast %45 : vector<1x1x1x256xf32> to vector<1x256xf32>
    %47 = vector.shape_cast %44 : vector<1x256xf32> to vector<1x1x1x256xf32>
    tpu.vector_store %arg5[%c0_29, %c0_30, %c3, %c0_31], %47 {strides = array<i32>} : memref<1x1x8x256xf32, #tpu.memory_space<vmem>>, vector<1x1x1x256xf32>,
    %c4_i32 = arith.constant 4 : i32
    %48 = tpu.dynamic_rotate %3 by %c4_i32 dim 1 : vector<2x256xf32>, i32 -> vector<2x256xf32>
    %49 = arith.mulf %1, %48 : vector<2x256xf32>
    %cst_32 = arith.constant dense<0.000000e+00> : vector<256xf32>
    %50 = vector.multi_reduction <add>, %49, %cst_32 [0] : vector<2x256xf32> to vector<256xf32>
    %51 = vector.shape_cast %50 : vector<256xf32> to vector<1x256xf32>
    %c4_i32_33 = arith.constant 4 : i32
    %52 = vector.broadcast %c4_i32_33 : i32 to vector<1x256xi32>
    %53 = arith.cmpi sge, %4, %52 : vector<1x256xi32>
    %cst_34 = arith.constant 0.000000e+00 : f32
    %54 = vector.broadcast %cst_34 : f32 to vector<1x256xf32>
    %55 = arith.select %53, %51, %54 : vector<1x256xi1>, vector<1x256xf32>
    %c0_35 = arith.constant 0 : index
    %c0_36 = arith.constant 0 : index
    %c4 = arith.constant 4 : index
    %c0_37 = arith.constant 0 : index
    %56 = vector.load %arg5[%c0_35, %c0_36, %c4, %c0_37] : memref<1x1x8x256xf32, #tpu.memory_space<vmem>>, vector<1x1x1x256xf32>
    %57 = vector.shape_cast %56 : vector<1x1x1x256xf32> to vector<1x256xf32>
    %58 = vector.shape_cast %55 : vector<1x256xf32> to vector<1x1x1x256xf32>
    tpu.vector_store %arg5[%c0_35, %c0_36, %c4, %c0_37], %58 {strides = array<i32>} : memref<1x1x8x256xf32, #tpu.memory_space<vmem>>, vector<1x1x1x256xf32>,
    %c5_i32 = arith.constant 5 : i32
    %59 = tpu.dynamic_rotate %3 by %c5_i32 dim 1 : vector<2x256xf32>, i32 -> vector<2x256xf32>
    %60 = arith.mulf %1, %59 : vector<2x256xf32>
    %cst_38 = arith.constant dense<0.000000e+00> : vector<256xf32>
    %61 = vector.multi_reduction <add>, %60, %cst_38 [0] : vector<2x256xf32> to vector<256xf32>
    %62 = vector.shape_cast %61 : vector<256xf32> to vector<1x256xf32>
    %c5_i32_39 = arith.constant 5 : i32
    %63 = vector.broadcast %c5_i32_39 : i32 to vector<1x256xi32>
    %64 = arith.cmpi sge, %4, %63 : vector<1x256xi32>
    %cst_40 = arith.constant 0.000000e+00 : f32
    %65 = vector.broadcast %cst_40 : f32 to vector<1x256xf32>
    %66 = arith.select %64, %62, %65 : vector<1x256xi1>, vector<1x256xf32>
    %c0_41 = arith.constant 0 : index
    %c0_42 = arith.constant 0 : index
    %c5 = arith.constant 5 : index
    %c0_43 = arith.constant 0 : index
    %67 = vector.load %arg5[%c0_41, %c0_42, %c5, %c0_43] : memref<1x1x8x256xf32, #tpu.memory_space<vmem>>, vector<1x1x1x256xf32>
    %68 = vector.shape_cast %67 : vector<1x1x1x256xf32> to vector<1x256xf32>
    %69 = vector.shape_cast %66 : vector<1x256xf32> to vector<1x1x1x256xf32>
    tpu.vector_store %arg5[%c0_41, %c0_42, %c5, %c0_43], %69 {strides = array<i32>} : memref<1x1x8x256xf32, #tpu.memory_space<vmem>>, vector<1x1x1x256xf32>,
    %c6_i32 = arith.constant 6 : i32
    %70 = tpu.dynamic_rotate %3 by %c6_i32 dim 1 : vector<2x256xf32>, i32 -> vector<2x256xf32>
    %71 = arith.mulf %1, %70 : vector<2x256xf32>
    %cst_44 = arith.constant dense<0.000000e+00> : vector<256xf32>
    %72 = vector.multi_reduction <add>, %71, %cst_44 [0] : vector<2x256xf32> to vector<256xf32>
    %73 = vector.shape_cast %72 : vector<256xf32> to vector<1x256xf32>
    %c6_i32_45 = arith.constant 6 : i32
    %74 = vector.broadcast %c6_i32_45 : i32 to vector<1x256xi32>
    %75 = arith.cmpi sge, %4, %74 : vector<1x256xi32>
    %cst_46 = arith.constant 0.000000e+00 : f32
    %76 = vector.broadcast %cst_46 : f32 to vector<1x256xf32>
    %77 = arith.select %75, %73, %76 : vector<1x256xi1>, vector<1x256xf32>
    %c0_47 = arith.constant 0 : index
    %c0_48 = arith.constant 0 : index
    %c6 = arith.constant 6 : index
    %c0_49 = arith.constant 0 : index
    %78 = vector.load %arg5[%c0_47, %c0_48, %c6, %c0_49] : memref<1x1x8x256xf32, #tpu.memory_space<vmem>>, vector<1x1x1x256xf32>
    %79 = vector.shape_cast %78 : vector<1x1x1x256xf32> to vector<1x256xf32>
    %80 = vector.shape_cast %77 : vector<1x256xf32> to vector<1x1x1x256xf32>
    tpu.vector_store %arg5[%c0_47, %c0_48, %c6, %c0_49], %80 {strides = array<i32>} : memref<1x1x8x256xf32, #tpu.memory_space<vmem>>, vector<1x1x1x256xf32>,
    %c7_i32 = arith.constant 7 : i32
    %81 = tpu.dynamic_rotate %3 by %c7_i32 dim 1 : vector<2x256xf32>, i32 -> vector<2x256xf32>
    %82 = arith.mulf %1, %81 : vector<2x256xf32>
    %cst_50 = arith.constant dense<0.000000e+00> : vector<256xf32>
    %83 = vector.multi_reduction <add>, %82, %cst_50 [0] : vector<2x256xf32> to vector<256xf32>
    %84 = vector.shape_cast %83 : vector<256xf32> to vector<1x256xf32>
    %c7_i32_51 = arith.constant 7 : i32
    %85 = vector.broadcast %c7_i32_51 : i32 to vector<1x256xi32>
    %86 = arith.cmpi sge, %4, %85 : vector<1x256xi32>
    %cst_52 = arith.constant 0.000000e+00 : f32
    %87 = vector.broadcast %cst_52 : f32 to vector<1x256xf32>
    %88 = arith.select %86, %84, %87 : vector<1x256xi1>, vector<1x256xf32>
    %c0_53 = arith.constant 0 : index
    %c0_54 = arith.constant 0 : index
    %c7 = arith.constant 7 : index
    %c0_55 = arith.constant 0 : index
    %89 = vector.load %arg5[%c0_53, %c0_54, %c7, %c0_55] : memref<1x1x8x256xf32, #tpu.memory_space<vmem>>, vector<1x1x1x256xf32>
    %90 = vector.shape_cast %89 : vector<1x1x1x256xf32> to vector<1x256xf32>
    %91 = vector.shape_cast %88 : vector<1x256xf32> to vector<1x1x1x256xf32>
    tpu.vector_store %arg5[%c0_53, %c0_54, %c7, %c0_55], %91 {strides = array<i32>} : memref<1x1x8x256xf32, #tpu.memory_space<vmem>>, vector<1x1x1x256xf32>,
    return
  }
  func.func @transform_0(%arg0: i32, %arg1: i32) -> (i32, i32, i32, i32) {
    %c0_i32 = arith.constant 0 : i32
    %c0_i32_0 = arith.constant 0 : i32
    %c0_i32_1 = arith.constant 0 : i32
    return %arg0, %arg1, %c0_i32, %c0_i32_0 : i32, i32, i32, i32
  }
  func.func @transform_1(%arg0: i32, %arg1: i32) -> (i32, i32, i32, i32) {
    %c0_i32 = arith.constant 0 : i32
    %c0_i32_0 = arith.constant 0 : i32
    %c0_i32_1 = arith.constant 0 : i32
    return %arg0, %arg1, %c0_i32, %c0_i32_0 : i32, i32, i32, i32
  }
  func.func @transform_2(%arg0: i32, %arg1: i32) -> (i32, i32) {
    %c0_i32 = arith.constant 0 : i32
    %c0_i32_0 = arith.constant 0 : i32
    %c0_i32_1 = arith.constant 0 : i32
    return %c0_i32, %c0_i32_0 : i32, i32
  }
  func.func @transform_3(%arg0: i32, %arg1: i32) -> (i32, i32, i32, i32) {
    %c0_i32 = arith.constant 0 : i32
    %c0_i32_0 = arith.constant 0 : i32
    %c0_i32_1 = arith.constant 0 : i32
    return %arg0, %arg1, %c0_i32, %c0_i32_0 : i32, i32, i32, i32
  }
}

</mosaic_0001>

<bundles_post_ra>
// kernel: tpu_custom_call.1
= control target key start
LH: loop header
LB: loop body
LE: loop exit
PB: predicated region body
PF: predicated region fallthrough
CT: control target
= control target key end

     0   :  { %s1436_s0 = inlined_call_operand.hbm [shape: f32[2,4,2,256], index: 0, kind: input, shape index: {}]   ;;  %s1437_s1 = inlined_call_operand.hbm [shape: f32[2,4,2,256], index: 1, kind: input, shape index: {}]   ;;  %s1438_s2 = inlined_call_operand.hbm [shape: s32[1,256], index: 2, kind: input, shape index: {}]   ;;  %s1439_s3 = inlined_call_operand.hbm [shape: f32[2,4,8,256], index: 3, kind: output, shape index: {}]  }
   0x1   :  { %1445 = sst [smem:[#allocation19_spill]] %s1438_s2 }
   0x2   :  { %8 = vsyncpa [#allocation3], 0 }
   0x3   :  { %10 = vsyncpa [#allocation3 + $0x1], 0 }
   0x4   :  { %11 = vsyncpa [#allocation6], 0 }
   0x5   :  { %13 = vsyncpa [#allocation6 + $0x1], 0 }
   0x6   :  { %14 = vsyncpa [#allocation4], 0 }
   0x7   :  { %16 = vsyncpa [#allocation4 + $0x1], 0  ;;  %s1142_s12 = smov 0   ;;  %s1144_s13 = smov 0  }
   0x8   :  { %s1146_s14 = smov 0   ;;  %s1148_s15 = smov 0  }
   0x9   :  { %s1150_s16 = smov 0   ;;  %s1152_s17 = smov 0  }
   0xa   :  { %s1154_s18 = smov 0   ;;  %s1156_s19 = smov 0  }
   0xb LB: > { %1446 = sst [smem:[#allocation13_spill]] %s1104_s17  ;;  %s1183_s20 = sadd.s32 4294967295, %s1112_s19   ;;  %s1112_s19 = sphi %s1156_s19, %s22_s19   ;;  %s1108_s18 = sphi %s1154_s18, %s1466_s18   ;;  %s1104_s17 = sphi %s1152_s17, %s1465_s17   ;;  %s1100_s16 = sphi %s1150_s16, %s1464_s16   ;;  %s1096_s15 = sphi %s1148_s15, %s1463_s15   ;;  %s1092_s14 = sphi %s1146_s14, %s1469_s14   ;;  %s1088_s13 = sphi %s1144_s13, %s1468_s13   ;;  %s1084_s12 = sphi %s1142_s12, %s1467_s12  }
   0xc   : > { %1447 = sst [smem:[#allocation14_spill]] %s1108_s18  ;;  %s785_s21 = sadd.s32 4294967294, %s1112_s19  }
   0xd   : > { %p56_p0 = scmp.ne.s32.totalorder %s1088_s13, %s1084_s12  ;;  %p57_p1 = scmp.eq.s32.totalorder %s1183_s20, 0 }
   0xe   : > { %p131_p2 = scmp.eq.s32.totalorder %s1183_s20, 7  ;;  %p137_p3 = scmp.eq.s32.totalorder %s785_s21, 7 }
   0xf   : > { %p1192_p4 = por %p57_p1, %p56_p0  ;;  %p786_p5 = scmp.ge.s32.totalorder %s1112_s19, 1 }
  0x10   : > { %p1197_p6 = por %p137_p3, %p56_p0  ;;  %p144_p7 = scmp.lt.s32.totalorder %s1112_s19, 9 }
  0x11   : > { %s1451_s2 = sld [smem:[#allocation19_spill]]  ;;  %s1114_s28 = smov [#allocation7]  }
  0x12   : > { %s1449_s23 = scalar_select %p1197_p6, 1, 0 }
  0x13   : > { %p1205_p8 = pnand %p786_p5, %p144_p7  ;;  %s158_s29 = sshll.u32 %s1114_s28, 4  ;;  %s159_s29 = int_to_ptr.vmem [resolvable:$true] %s158_s29 }
  0x14   : > { %1450 = sst [smem:[#allocation15_spill]] %s1449_s23  ;;  %s31_s30 = sadd.s32 1, %s1104_s17 }
  0x15   : > { %p825_p9 = pneg %p1205_p8  ;;  %p32_p11 = scmp.ge.s32.totalorder %s31_s30, 4 }
  0x16   : > { %s34_s4 = sadd.s32 1, %s1108_s18  ;;  %s43_s5 = sadd.s32 1, %s1092_s14 }
  0x17   : > { %s156_s26 = sshll.u32 %s1451_s2, 4  ;;  %p826_p10 = pnand %p825_p9, %p57_p1  ;;  %s157_s26 = int_to_ptr.hbm [resolvable:$true] %s156_s26 }
  0x18   : > { %p50_p12 = scmp.ne.s32.totalorder %s1092_s14, %s1088_s13  ;;  %s1471_s30 = smov (%p32_p11, %s31_s30), 0 }
  0x19   : > { %828 = dma.hbm_to_vmem [thread:$0]  (!%p826_p10), %s157_s26, 32, %s159_s29, [#allocation6]  }
  0x1a   : > { %1453 = sst [smem:[#allocation16_spill]] %s1471_s30  ;;  %s1473_s4 = smov (!%p32_p11, %s34_s4), %s1108_s18 }
  0x1b   : > { %s39_s6 = ssub.s32 %s1104_s17, %s1471_s30  ;;  %p51_p13 = scmp.eq.s32.totalorder %s1112_s19, 0 }
  0x1c   : > { %p36_p0 = scmp.ge.s32.totalorder %s1473_s4, 2  ;;  %p1226_p3 = por %p131_p2, %p50_p12 }
  0x1d   : > { %p1230_p5 = por %p51_p13, %p50_p12  ;;  %p841_p7 = scmp.lt.s32.totalorder %s1112_s19, 8 }
  0x1e   : > { %s1475_s4 = smov (%p36_p0, %s1473_s4), 0  ;;  %s169_s9 = sand.u32 1, %s1092_s14  }
  0x1f   : > { %1456 = sst [smem:[#allocation17_spill]] %s1475_s4  ;;  %s790_s10 = sshll.u32 %s1104_s17, 1 }
  0x20   : > { %s38_s11 = ssub.s32 %s1108_s18, %s1475_s4  ;;  %s789_s24 = sshll.u32 %s169_s9, 2 }
  0x21   : > { %s40_s21 = sor.u32 %s39_s6, %s38_s11  ;;  %s791_s25 = sshll.u32 %s1108_s18, 3 }
  0x22   : > { %p41_p2 = scmp.eq.s32.totalorder %s40_s21, 0  ;;  %s173_s26 = scalar_lea.vmem [#allocation2], %s789_s24 }
  0x23   : > { %s184_s28 = sshll.u32 %s173_s26, 4  ;;  %s178_s2 = sadd.s32 %s791_s25, %s790_s10  ;;  %s185_s28 = int_to_ptr.vmem [resolvable:$true] %s184_s28 }
  0x24   : > { %s1243_s29 = scalar_select %p41_p2, %s1092_s14, %s43_s5  }
  0x25   : > { %s792_s30 = sshll.u32 %s178_s2, 1  ;;  %p1249_p9 = pnand %p841_p7, %p1230_p5 }
  0x26   : > { %1457 = sst [smem:[#allocation18_spill]] %s1243_s29  ;;  %s180_s6 = scalar_lea.hbm %s1436_s0, %s792_s30 }
  0x27   : > { %s182_s11 = sshll.u32 %s180_s6, 4  ;;  %s202_s10 = scalar_lea.hbm %s1437_s1, %s792_s30  ;;  %s183_s11 = int_to_ptr.hbm [resolvable:$true] %s182_s11 }
  0x28   : > { %s170_s25 = scalar_lea.sflag [#allocation3], %s169_s9  ;;  %s191_s2 = sand.u32 1, %s1112_s19  }
  0x29   : > { %832 = dma.hbm_to_vmem [thread:$0]  (!%p1249_p9), %s183_s11, 64, %s185_s28, %s170_s25  }
  0x2a   : > { %s204_s8 = sshll.u32 %s202_s10, 4  ;;  %s195_s26 = scalar_lea.vmem [#allocation5], %s789_s24  ;;  %s205_s8 = int_to_ptr.hbm [resolvable:$true] %s204_s8 }
  0x2b   : > { %s206_s18 = sshll.u32 %s195_s26, 4  ;;  %s192_s29 = scalar_lea.sflag [#allocation6], %s191_s2  ;;  %s207_s18 = int_to_ptr.vmem [resolvable:$true] %s206_s18 }
  0x2c   : > { %835 = dma.hbm_to_vmem [thread:$0]  (!%p1249_p9), %s205_s8, 64, %s207_s18, %s192_s29  }
  0x2d   : > { %215 = sbr.rel (%p1205_p8) target bundleno = 1046 (0x416), region = 32  ;;  %s1267_s17 = sand.u32 (!%p1205_p8), 1, %s1088_s13  }
  0x2e   : > { %s798_s30 = sshll.u32 (!%p1205_p8), %s1267_s17, 2  ;;  %s218_s4 = scalar_lea.sflag (!%p1205_p8), [#allocation3], %s1267_s17 }
  0x2f   : > { %s221_s9 = scalar_lea.vmem (!%p1205_p8), [#allocation2], %s798_s30 }
  0x32   : > { %1067 = dma.done.wait (%p1192_p4), %s218_s4, 64  }
  0x33   : > { %1069 = vsyncadd (%p1192_p4), %s218_s4, 4294967232  ;;  %s227_s18 = sand.u32 1, %s1183_s20   ;;  %s231_s27 = scalar_lea.vmem [#allocation5], %s798_s30 }
  0x34   : > { %s228_s23 = scalar_lea.sflag [#allocation6], %s227_s18 }
  0x35   : > { %1071 = dma.done.wait (%p1192_p4), %s228_s23, 64  }
  0x36   : > { %1073 = vsyncadd (%p1192_p4), %s228_s23, 4294967232 }
  0x37   : > { %1075 = dma.done.wait (%p57_p1), [#allocation6], 32  }
  0x38   : > { %1077 = vsyncadd (%p57_p1), [#allocation6], 4294967264  ;;  %v1284_v0 = vld [vmem:[%s221_s9] sm:$0xf]  ;;  %v1286_v1 = vld [vmem:[%s231_s27] sm:$0xf]  ;;  %v298_v7 = vlaneseq }
  0x39   : > { %v268_v2 = vmul.f32 %v1286_v1, %v1284_v0  ;;  %s1115_s22 = smov 1   ;;  %vm275_vm1 = vcmask 1041408   ;;  %s1116_s20 = smov 2   ;;  %v1303_v31 = vld [vmem:[#allocation7] sm:$0x3]  ;;  %vm294_vm2 = vcmask 1040384  }
  0x3a   : > { %v1295_v9 = vand.u32 127, %v298_v7  ;;  %s801_s24 = sshll.u32 %s1267_s17, 4  ;;  %vm345_vm3 = vcmp.ge.s32.totalorder %v1303_v31, 1  ;;  %vm1307_vm4 = vcmp.lt.s32.totalorder %v298_v7, 256  ;;  %s1117_s29 = smov 3   ;;  %vm393_vm6 = vcmp.ge.s32.totalorder %v1303_v31, 2 }
  0x3b   : > { %270 = vst [vmem:[#allocation1] ss:$4 sm:$0xff] %v268_v2  ;;  %s1312_s28 = scalar_lea.vmem [#allocation8], %s801_s24  ;;  %s1118_s6 = smov 4   ;;  %vm441_vm8 = vcmp.ge.s32.totalorder %v1303_v31, 3  ;;  %vm489_vm10 = vcmp.ge.s32.totalorder %v1303_v31, 4 }
  0x3c   : > { %vm316_vm0 = vcmp.lt.s32.totalorder %v1295_v9, 1  ;;  %vm364_vm5 = vcmp.lt.s32.totalorder %v1295_v9, 2  ;;  %vm412_vm7 = vcmp.lt.s32.totalorder %v1295_v9, 3  ;;  %vm460_vm9 = vcmp.lt.s32.totalorder %v1295_v9, 4  ;;  %s1119_s11 = smov 5   ;;  %s1120_s21 = smov 6  }
  0x3d   : > { %vm508_vm11 = vcmp.lt.s32.totalorder %v1295_v9, 5  ;;  %vm537_vm12 = vcmp.ge.s32.totalorder %v1303_v31, 5  ;;  %vm556_vm13 = vcmp.lt.s32.totalorder %v1295_v9, 6  ;;  %s1121_s5 = smov 7   ;;  %vm585_vm14 = vcmp.ge.s32.totalorder %v1303_v31, 6  ;;  %s810_s10 = sshll.u32 %s1096_s15, 1 }
  0x3e   : > { %vm290_vm15 = vcmp.ge.s32.totalorder %v1303_v31, 0  ;;  %s811_s25 = sshll.u32 %s1100_s16, 3  ;;  %s659_s16 = sshll.u32 %s1312_s28, 4  ;;  %s660_s16 = int_to_ptr.vmem [resolvable:$true] %s659_s16 }
  0x3f   : > { %s655_s2 = sadd.s32 %s811_s25, %s810_s10  ;;  %s644_s9 = scalar_lea.sflag [#allocation4], %s1267_s17 }
  0x40   : > { %s812_s8 = sshll.u32 %s655_s2, 3 }
  0x41   : > { %s657_s15 = scalar_lea.hbm %s1439_s3, %s812_s8 }
  0x42   : > { %v1290_v3 = vld.sshfl [vmem:[#allocation1] sm:$0xff pattern:$0x73625140]  ;;  %v1292_v4 = vld.sshfl [vmem:[#allocation1 + $0x8] sm:$0xff pattern:$0x73625140] }
  0x43   : > { %305 = vst [vmem:[#allocation1] ss:$4 sm:$0xff] %v1286_v1  ;;  %s661_s4 = sshll.u32 %s657_s15, 4  ;;  %s662_s4 = int_to_ptr.hbm [resolvable:$true] %s661_s4 }
  0x44   : > { %s1020_s18 = sshra.s32 %s662_s4, 4  ;;  %s1021_s18 = int_to_ptr.hbm [resolvable:$true] %s1020_s18 }
  0x45   : > { %s1022_s23 = scalar_lea.hbm %s1021_s18, 16  ;;  %p1027_p10 = scmp.lt.s32.totalorder %s1021_s18, %s1439_s3 }
  0x46   : > { %p1023_p1 = scmp.ne.s32.totalorder %s1021_s18, %s1022_s23 }
  0x48   : > { %p1024_p4 = pnand %p1023_p1, %p1226_p3 }
  0x4a   : > { %v306_v5 = vld.sshfl [vmem:[#allocation1] sm:$0xff pattern:$0x73625140]  ;;  %v307_v6 = vld.sshfl [vmem:[#allocation1 + $0x8] sm:$0xff pattern:$0x73625140]  ;;  %p1025_p8 = pneg %p1024_p4 }
  0x4b   : > { %310 = vrot.lane.b32.xlu0 %v306_v5, %s1115_s22 }
  0x53   : > { %312 = vrot.lane.b32.xlu0 %v307_v6, %s1115_s22 }
  0xbd   : > { %v311_v8 = vpop.permute.xlu0 %310 }
  0xc5   : > { %v313_v10 = vpop.permute.xlu0 %312 }
  0xc6   : > { %v317_v11 = vsel %vm316_vm0, %v311_v8, %v313_v10  ;;  %v318_v13 = vsel %vm316_vm0, %v313_v10, %v311_v8  ;;  %vm604_vm0 = vcmp.lt.s32.totalorder %v1295_v9, 7 }
  0xc7   : > { %v321_v12 = vrot.slane %v317_v11, 6 }
  0xc9   : > { %v322_v14 = vsel %vm275_vm1, %v318_v13, %v321_v12 }
  0xca   : > { %v324_v15 = vmul.f32 %v322_v14, %v1284_v0 }
  0xcc   : > { %326 = vst [vmem:[#allocation1] ss:$4 sm:$0xff] %v324_v15 }
  0xd3   : > { %v327_v16 = vld.sshfl [vmem:[#allocation1] sm:$0xff pattern:$0x73625140]  ;;  %v328_v17 = vld.sshfl [vmem:[#allocation1 + $0x8] sm:$0xff pattern:$0x73625140] }
  0xd4   : > { %355 = vst [vmem:[#allocation1] ss:$4 sm:$0xff] %v1286_v1  ;;  %v331_v18 = vsel %vm275_vm1, %v327_v16, 0.0  ;;  %v338_v19 = vsel %vm275_vm1, %v328_v17, 0.0 }
  0xd5   : > { %v332_v20 = vrot.slane %v331_v18, 4  ;;  %v339_v21 = vrot.slane %v338_v19, 4 }
  0xd7   : > { %v333_v22 = vadd.f32 %v332_v20, %v331_v18  ;;  %v340_v23 = vadd.f32 %v339_v21, %v338_v19 }
  0xd9   : > { %v334_v24 = vrot.slane %v333_v22, 2  ;;  %v341_v25 = vrot.slane %v340_v23, 2 }
  0xdb   : > { %v356_v26 = vld.sshfl [vmem:[#allocation1] sm:$0xff pattern:$0x73625140]  ;;  %v335_v27 = vadd.f32 %v334_v24, %v333_v22  ;;  %v342_v28 = vadd.f32 %v341_v25, %v340_v23  ;;  %v357_v33 = vld.sshfl [vmem:[#allocation1 + $0x8] sm:$0xff pattern:$0x73625140] }
  0xdc   : > { %360 = vrot.lane.b32.xlu1 %v356_v26, %s1116_s20 }
  0xdd   : > { %v336_v29 = vrot.slane %v335_v27, 1  ;;  %v343_v30 = vrot.slane %v342_v28, 1 }
  0xdf   : > { %v344_v32 = vadd.f32 %v343_v30, %v342_v28  ;;  %v337_v34 = vadd.f32 %v336_v29, %v335_v27 }
  0xe1   : > { %v348_v35 = vrot.slane %v344_v32, 7 }
  0xe3   : > { %v349_v37 = vsel %vm294_vm2, %v337_v34, %v348_v35 }
  0xe4   : > { %362 = vrot.lane.b32.xlu1 %v357_v33, %s1116_s20  ;;  %v351_v38 = vsel %vm345_vm3, %v349_v37, 0.0  ;;  %s1026_s20 = scalar_lea.hbm %s1439_s3, 128 }
  0xe5   : > { %802 = vst.msk [vmem:[%s1312_s28 + $0x1] ss:$8 sm:$0x3] %vm1307_vm4, %v351_v38  ;;  %p1028_p11 = scmp.lt.s32.totalorder %s1026_s20, %s1022_s23 }
  0xe7   : > { %p1029_p12 = por %p1028_p11, %p1027_p10 }
  0xe9   : > { %p1030_p13 = pnand %p1029_p12, %p1025_p8 }
 0x14e   : > { %v361_v39 = vpop.permute.xlu1 %360 }
 0x156   : > { %v363_v40 = vpop.permute.xlu1 %362 }
 0x157   : > { %v365_v41 = vsel %vm364_vm5, %v361_v39, %v363_v40  ;;  %v366_v43 = vsel %vm364_vm5, %v363_v40, %v361_v39 }
 0x158   : > { %v369_v42 = vrot.slane %v365_v41, 6 }
 0x15a   : > { %v370_v44 = vsel %vm275_vm1, %v366_v43, %v369_v42 }
 0x15b   : > { %v372_v45 = vmul.f32 %v370_v44, %v1284_v0 }
 0x15d   : > { %374 = vst [vmem:[#allocation1] ss:$4 sm:$0xff] %v372_v45 }
 0x164   : > { %v375_v46 = vld.sshfl [vmem:[#allocation1] sm:$0xff pattern:$0x73625140]  ;;  %v376_v47 = vld.sshfl [vmem:[#allocation1 + $0x8] sm:$0xff pattern:$0x73625140] }
 0x165   : > { %403 = vst [vmem:[#allocation1] ss:$4 sm:$0xff] %v1286_v1  ;;  %v379_v48 = vsel %vm275_vm1, %v375_v46, 0.0  ;;  %v386_v49 = vsel %vm275_vm1, %v376_v47, 0.0 }
 0x166   : > { %v380_v50 = vrot.slane %v379_v48, 4  ;;  %v387_v51 = vrot.slane %v386_v49, 4 }
 0x168   : > { %v381_v52 = vadd.f32 %v380_v50, %v379_v48  ;;  %v388_v53 = vadd.f32 %v387_v51, %v386_v49 }
 0x16a   : > { %v382_v54 = vrot.slane %v381_v52, 2  ;;  %v389_v55 = vrot.slane %v388_v53, 2 }
 0x16c   : > { %v404_v56 = vld.sshfl [vmem:[#allocation1] sm:$0xff pattern:$0x73625140]  ;;  %v383_v57 = vadd.f32 %v382_v54, %v381_v52  ;;  %v390_v58 = vadd.f32 %v389_v55, %v388_v53  ;;  %v405_v62 = vld.sshfl [vmem:[#allocation1 + $0x8] sm:$0xff pattern:$0x73625140] }
 0x16d   : > { %408 = vrot.lane.b32.xlu2 %v404_v56, %s1117_s29 }
 0x16e   : > { %v384_v59 = vrot.slane %v383_v57, 1  ;;  %v391_v60 = vrot.slane %v390_v58, 1 }
 0x170   : > { %v392_v61 = vadd.f32 %v391_v60, %v390_v58  ;;  %v385_v63 = vadd.f32 %v384_v59, %v383_v57 }
 0x172   : > { %v396_v2 = vrot.slane %v392_v61, 7 }
 0x174   : > { %v397_v5 = vsel %vm294_vm2, %v385_v63, %v396_v2 }
 0x175   : > { %410 = vrot.lane.b32.xlu2 %v405_v62, %s1117_s29  ;;  %v399_v6 = vsel %vm393_vm6, %v397_v5, 0.0 }
 0x176   : > { %803 = vst.msk [vmem:[%s1312_s28 + $0x2] ss:$8 sm:$0x3] %vm1307_vm4, %v399_v6 }
 0x1c7   : > { %v409_v7 = vpop.permute.xlu2 %408 }
 0x1cf   : > { %v411_v8 = vpop.permute.xlu2 %410 }
 0x1d0   : > { %v413_v10 = vsel %vm412_vm7, %v409_v7, %v411_v8  ;;  %v414_v12 = vsel %vm412_vm7, %v411_v8, %v409_v7 }
 0x1d1   : > { %v417_v11 = vrot.slane %v413_v10, 6 }
 0x1d3   : > { %v418_v13 = vsel %vm275_vm1, %v414_v12, %v417_v11 }
 0x1d4   : > { %v420_v14 = vmul.f32 %v418_v13, %v1284_v0 }
 0x1d6   : > { %422 = vst [vmem:[#allocation1] ss:$4 sm:$0xff] %v420_v14 }
 0x1dd   : > { %v423_v15 = vld.sshfl [vmem:[#allocation1] sm:$0xff pattern:$0x73625140]  ;;  %v424_v16 = vld.sshfl [vmem:[#allocation1 + $0x8] sm:$0xff pattern:$0x73625140] }
 0x1de   : > { %451 = vst [vmem:[#allocation1] ss:$4 sm:$0xff] %v1286_v1  ;;  %v427_v17 = vsel %vm275_vm1, %v423_v15, 0.0  ;;  %v434_v18 = vsel %vm275_vm1, %v424_v16, 0.0 }
 0x1df   : > { %v428_v19 = vrot.slane %v427_v17, 4  ;;  %v435_v20 = vrot.slane %v434_v18, 4 }
 0x1e1   : > { %v429_v21 = vadd.f32 %v428_v19, %v427_v17  ;;  %v436_v22 = vadd.f32 %v435_v20, %v434_v18 }
 0x1e3   : > { %v430_v23 = vrot.slane %v429_v21, 2  ;;  %v437_v24 = vrot.slane %v436_v22, 2 }
 0x1e5   : > { %v453_v25 = vld.sshfl [vmem:[#allocation1 + $0x8] sm:$0xff pattern:$0x73625140]  ;;  %v452_v26 = vld.sshfl [vmem:[#allocation1] sm:$0xff pattern:$0x73625140]  ;;  %v431_v27 = vadd.f32 %v430_v23, %v429_v21  ;;  %v438_v28 = vadd.f32 %v437_v24, %v436_v22 }
 0x1e6   : > { %458 = vrot.lane.b32.xlu1 %v453_v25, %s1118_s6  ;;  %456 = vrot.lane.b32.xlu0 %v452_v26, %s1118_s6 }
 0x1e7   : > { %v432_v29 = vrot.slane %v431_v27, 1  ;;  %v439_v30 = vrot.slane %v438_v28, 1 }
 0x1e9   : > { %v440_v32 = vadd.f32 %v439_v30, %v438_v28  ;;  %v433_v33 = vadd.f32 %v432_v29, %v431_v27 }
 0x1eb   : > { %v444_v34 = vrot.slane %v440_v32, 7 }
 0x1ed   : > { %v445_v35 = vsel %vm294_vm2, %v433_v33, %v444_v34 }
 0x1ee   : > { %v447_v37 = vsel %vm441_vm8, %v445_v35, 0.0 }
 0x1ef   : > { %804 = vst.msk [vmem:[%s1312_s28 + $0x3] ss:$8 sm:$0x3] %vm1307_vm4, %v447_v37 }
 0x258   : > { %v459_v38 = vpop.permute.xlu1 %458  ;;  %v457_v39 = vpop.permute.xlu0 %456 }
 0x259   : > { %v461_v40 = vsel %vm460_vm9, %v457_v39, %v459_v38  ;;  %v462_v42 = vsel %vm460_vm9, %v459_v38, %v457_v39 }
 0x25a   : > { %v465_v41 = vrot.slane %v461_v40, 6 }
 0x25c   : > { %v466_v43 = vsel %vm275_vm1, %v462_v42, %v465_v41 }
 0x25d   : > { %v468_v44 = vmul.f32 %v466_v43, %v1284_v0 }
 0x25f   : > { %470 = vst [vmem:[#allocation1] ss:$4 sm:$0xff] %v468_v44 }
 0x266   : > { %v471_v45 = vld.sshfl [vmem:[#allocation1] sm:$0xff pattern:$0x73625140]  ;;  %v472_v46 = vld.sshfl [vmem:[#allocation1 + $0x8] sm:$0xff pattern:$0x73625140] }
 0x267   : > { %499 = vst [vmem:[#allocation1] ss:$4 sm:$0xff] %v1286_v1  ;;  %v475_v47 = vsel %vm275_vm1, %v471_v45, 0.0  ;;  %v482_v48 = vsel %vm275_vm1, %v472_v46, 0.0 }
 0x268   : > { %v476_v49 = vrot.slane %v475_v47, 4  ;;  %v483_v50 = vrot.slane %v482_v48, 4 }
 0x26a   : > { %v477_v51 = vadd.f32 %v476_v49, %v475_v47  ;;  %v484_v52 = vadd.f32 %v483_v50, %v482_v48 }
 0x26c   : > { %v478_v53 = vrot.slane %v477_v51, 2  ;;  %v485_v54 = vrot.slane %v484_v52, 2 }
 0x26e   : > { %v501_v55 = vld.sshfl [vmem:[#allocation1 + $0x8] sm:$0xff pattern:$0x73625140]  ;;  %v500_v56 = vld.sshfl [vmem:[#allocation1] sm:$0xff pattern:$0x73625140]  ;;  %v479_v57 = vadd.f32 %v478_v53, %v477_v51  ;;  %v486_v58 = vadd.f32 %v485_v54, %v484_v52 }
 0x26f   : > { %506 = vrot.lane.b32.xlu0 %v501_v55, %s1119_s11  ;;  %504 = vrot.lane.b32.xlu2 %v500_v56, %s1119_s11 }
 0x270   : > { %v480_v59 = vrot.slane %v479_v57, 1  ;;  %v487_v60 = vrot.slane %v486_v58, 1 }
 0x272   : > { %v488_v61 = vadd.f32 %v487_v60, %v486_v58  ;;  %v481_v62 = vadd.f32 %v480_v59, %v479_v57 }
 0x274   : > { %v492_v63 = vrot.slane %v488_v61, 7 }
 0x276   : > { %v493_v2 = vsel %vm294_vm2, %v481_v62, %v492_v63 }
 0x277   : > { %v495_v5 = vsel %vm489_vm10, %v493_v2, 0.0  ;;  %v276_v2 = vsel %vm275_vm1, %v1290_v3, 0.0 }
 0x278   : > { %805 = vst.msk [vmem:[%s1312_s28 + $0x4] ss:$8 sm:$0x3] %vm1307_vm4, %v495_v5  ;;  %v283_v5 = vsel %vm275_vm1, %v1292_v4, 0.0 }
 0x2c9   : > { %v505_v6 = vpop.permute.xlu2 %504 }
 0x2e1   : > { %v507_v7 = vpop.permute.xlu0 %506 }
 0x2e2   : > { %v509_v8 = vsel %vm508_vm11, %v505_v6, %v507_v7  ;;  %v510_v11 = vsel %vm508_vm11, %v507_v7, %v505_v6  ;;  %v277_v6 = vrot.slane %v276_v2, 4  ;;  %v284_v7 = vrot.slane %v283_v5, 4 }
 0x2e3   : > { %v513_v10 = vrot.slane %v509_v8, 6 }
 0x2e4   : > { %v278_v8 = vadd.f32 %v277_v6, %v276_v2 }
 0x2e5   : > { %v514_v12 = vsel %vm275_vm1, %v510_v11, %v513_v10  ;;  %v285_v10 = vadd.f32 %v284_v7, %v283_v5 }
 0x2e6   : > { %v516_v13 = vmul.f32 %v514_v12, %v1284_v0  ;;  %v279_v11 = vrot.slane %v278_v8, 2 }
 0x2e7   : > { %v286_v12 = vrot.slane %v285_v10, 2 }
 0x2e8   : > { %518 = vst [vmem:[#allocation1] ss:$4 sm:$0xff] %v516_v13  ;;  %v280_v13 = vadd.f32 %v279_v11, %v278_v8 }
 0x2ef   : > { %v519_v14 = vld.sshfl [vmem:[#allocation1] sm:$0xff pattern:$0x73625140]  ;;  %v520_v15 = vld.sshfl [vmem:[#allocation1 + $0x8] sm:$0xff pattern:$0x73625140] }
 0x2f0   : > { %547 = vst [vmem:[#allocation1] ss:$4 sm:$0xff] %v1286_v1  ;;  %v523_v16 = vsel %vm275_vm1, %v519_v14, 0.0  ;;  %v530_v17 = vsel %vm275_vm1, %v520_v15, 0.0  ;;  %v287_v14 = vadd.f32 %v286_v12, %v285_v10  ;;  %v281_v15 = vrot.slane %v280_v13, 1 }
 0x2f1   : > { %v524_v18 = vrot.slane %v523_v16, 4  ;;  %v531_v19 = vrot.slane %v530_v17, 4 }
 0x2f3   : > { %v525_v20 = vadd.f32 %v524_v18, %v523_v16  ;;  %v532_v21 = vadd.f32 %v531_v19, %v530_v17  ;;  %v288_v16 = vrot.slane %v287_v14, 1  ;;  %v282_v17 = vadd.f32 %v281_v15, %v280_v13 }
 0x2f5   : > { %v526_v22 = vrot.slane %v525_v20, 2  ;;  %v533_v23 = vrot.slane %v532_v21, 2  ;;  %v289_v18 = vadd.f32 %v288_v16, %v287_v14 }
 0x2f7   : > { %v548_v24 = vld.sshfl [vmem:[#allocation1] sm:$0xff pattern:$0x73625140]  ;;  %v549_v25 = vld.sshfl [vmem:[#allocation1 + $0x8] sm:$0xff pattern:$0x73625140]  ;;  %v527_v26 = vadd.f32 %v526_v22, %v525_v20  ;;  %v534_v27 = vadd.f32 %v533_v23, %v532_v21 }
 0x2f8   : > { %552 = vrot.lane.b32.xlu1 %v548_v24, %s1120_s21  ;;  %554 = vrot.lane.b32.xlu2 %v549_v25, %s1120_s21  ;;  %v293_v19 = vrot.slane %v289_v18, 7 }
 0x2f9   : > { %v528_v28 = vrot.slane %v527_v26, 1  ;;  %v535_v29 = vrot.slane %v534_v27, 1 }
 0x2fa   : > { %v295_v3 = vsel %vm294_vm2, %v282_v17, %v293_v19 }
 0x2fb   : > { %v536_v30 = vadd.f32 %v535_v29, %v534_v27  ;;  %v529_v32 = vadd.f32 %v528_v28, %v527_v26  ;;  %v297_v4 = vsel %vm290_vm15, %v295_v3, 0.0 }
 0x2fc   : > { %302 = vst.msk [vmem:[%s1312_s28] ss:$8 sm:$0x3] %vm1307_vm4, %v297_v4 }
 0x2fd   : > { %v540_v33 = vrot.slane %v536_v30, 7 }
 0x2ff   : > { %v541_v34 = vsel %vm294_vm2, %v529_v32, %v540_v33 }
 0x300   : > { %v543_v35 = vsel %vm537_vm12, %v541_v34, 0.0 }
 0x301   : > { %806 = vst.msk [vmem:[%s1312_s28 + $0x5] ss:$8 sm:$0x3] %vm1307_vm4, %v543_v35 }
 0x352   : > { %v555_v37 = vpop.permute.xlu2 %554 }
 0x36a   : > { %v553_v38 = vpop.permute.xlu1 %552 }
 0x36b   : > { %v557_v39 = vsel %vm556_vm13, %v553_v38, %v555_v37  ;;  %v558_v41 = vsel %vm556_vm13, %v555_v37, %v553_v38 }
 0x36c   : > { %v561_v40 = vrot.slane %v557_v39, 6 }
 0x36e   : > { %v562_v42 = vsel %vm275_vm1, %v558_v41, %v561_v40 }
 0x36f   : > { %v564_v43 = vmul.f32 %v562_v42, %v1284_v0 }
 0x371   : > { %566 = vst [vmem:[#allocation1] ss:$4 sm:$0xff] %v564_v43 }
 0x378   : > { %v567_v44 = vld.sshfl [vmem:[#allocation1] sm:$0xff pattern:$0x73625140]  ;;  %v568_v45 = vld.sshfl [vmem:[#allocation1 + $0x8] sm:$0xff pattern:$0x73625140] }
 0x379   : > { %595 = vst [vmem:[#allocation1] ss:$4 sm:$0xff] %v1286_v1  ;;  %v571_v46 = vsel %vm275_vm1, %v567_v44, 0.0  ;;  %v578_v47 = vsel %vm275_vm1, %v568_v45, 0.0 }
 0x37a   : > { %v572_v48 = vrot.slane %v571_v46, 4  ;;  %v579_v49 = vrot.slane %v578_v47, 4 }
 0x37c   : > { %v573_v50 = vadd.f32 %v572_v48, %v571_v46  ;;  %v580_v51 = vadd.f32 %v579_v49, %v578_v47 }
 0x37e   : > { %v574_v52 = vrot.slane %v573_v50, 2  ;;  %v581_v53 = vrot.slane %v580_v51, 2 }
 0x380   : > { %v597_v54 = vld.sshfl [vmem:[#allocation1 + $0x8] sm:$0xff pattern:$0x73625140]  ;;  %v596_v55 = vld.sshfl [vmem:[#allocation1] sm:$0xff pattern:$0x73625140]  ;;  %v575_v56 = vadd.f32 %v574_v52, %v573_v50  ;;  %v582_v57 = vadd.f32 %v581_v53, %v580_v51 }
 0x381   : > { %602 = vrot.lane.b32.xlu1 %v597_v54, %s1121_s5  ;;  %600 = vrot.lane.b32.xlu0 %v596_v55, %s1121_s5 }
 0x382   : > { %v576_v58 = vrot.slane %v575_v56, 1  ;;  %v583_v1 = vrot.slane %v582_v57, 1 }
 0x384   : > { %v584_v59 = vadd.f32 %v583_v1, %v582_v57  ;;  %v577_v60 = vadd.f32 %v576_v58, %v575_v56 }
 0x386   : > { %v588_v61 = vrot.slane %v584_v59, 7 }
 0x388   : > { %v589_v62 = vsel %vm294_vm2, %v577_v60, %v588_v61 }
 0x389   : > { %v591_v63 = vsel %vm585_vm14, %v589_v62, 0.0 }
 0x38a   : > { %807 = vst.msk [vmem:[%s1312_s28 + $0x6] ss:$8 sm:$0x3] %vm1307_vm4, %v591_v63 }
 0x3f3   : > { %v603_v20 = vpop.permute.xlu1 %602  ;;  %v601_v21 = vpop.permute.xlu0 %600 }
 0x3f4   : > { %v605_v22 = vsel %vm604_vm0, %v601_v21, %v603_v20  ;;  %v606_v24 = vsel %vm604_vm0, %v603_v20, %v601_v21 }
 0x3f5   : > { %v609_v23 = vrot.slane %v605_v22, 6 }
 0x3f7   : > { %v610_v25 = vsel %vm275_vm1, %v606_v24, %v609_v23 }
 0x3f8   : > { %v612_v26 = vmul.f32 %v610_v25, %v1284_v0 }
 0x3fa   : > { %614 = vst [vmem:[#allocation1] ss:$4 sm:$0xff] %v612_v26 }
 0x401   : > { %v615_v27 = vld.sshfl [vmem:[#allocation1] sm:$0xff pattern:$0x73625140]  ;;  %v616_v28 = vld.sshfl [vmem:[#allocation1 + $0x8] sm:$0xff pattern:$0x73625140] }
 0x402   : > { %v619_v29 = vsel %vm275_vm1, %v615_v27, 0.0  ;;  %v626_v30 = vsel %vm275_vm1, %v616_v28, 0.0  ;;  %vm633_vm1 = vcmp.ge.s32.totalorder %v1303_v31, 7 }
 0x403   : > { %v620_v9 = vrot.slane %v619_v29, 4  ;;  %v627_v32 = vrot.slane %v626_v30, 4 }
 0x405   : > { %v621_v33 = vadd.f32 %v620_v9, %v619_v29  ;;  %v628_v34 = vadd.f32 %v627_v32, %v626_v30 }
 0x407   : > { %v622_v35 = vrot.slane %v621_v33, 2  ;;  %v629_v37 = vrot.slane %v628_v34, 2 }
 0x409   : > { %v623_v0 = vadd.f32 %v622_v35, %v621_v33  ;;  %v630_v38 = vadd.f32 %v629_v37, %v628_v34 }
 0x40b   : > { %v624_v39 = vrot.slane %v623_v0, 1  ;;  %v631_v40 = vrot.slane %v630_v38, 1 }
 0x40d   : > { %v632_v41 = vadd.f32 %v631_v40, %v630_v38  ;;  %v625_v42 = vadd.f32 %v624_v39, %v623_v0 }
 0x40f   : > { %v636_v43 = vrot.slane %v632_v41, 7 }
 0x411   : > { %v637_v44 = vsel %vm294_vm2, %v625_v42, %v636_v43 }
 0x412   : > { %v639_v45 = vsel %vm633_vm1, %v637_v44, 0.0 }
 0x413   : > { %808 = vst.msk [vmem:[%s1312_s28 + $0x7] ss:$8 sm:$0x3] %vm1307_vm4, %v639_v45 }
 0x414   : > { %1033 = shalt.err (!%p1030_p13)
}
 0x415   : > { %823 = dma.vmem_to_hbm [thread:$0]  (%p1226_p3), %s660_s16, 256, %s662_s4, %s644_s9  }
 0x416 PF: > { %p843_p0 = scmp.ge.s32.totalorder %s1112_s19, 2  ;;  %s673_s28 = sand.u32 1, %s1084_s12  }
 0x417   : > { %s674_s6 = scalar_lea.sflag [#allocation4], %s673_s28 }
 0x418   : > { %p837_p5 = pnand %p843_p0, %p1197_p6 }
 0x41a   : > { %p838_p7 = pneg %p837_p5 }
 0x41c   : > { %1079 = dma.done.wait (%p838_p7), %s674_s6, 256  }
 0x41d   : > { %1081 = vsyncadd (%p838_p7), %s674_s6, 4294967040  ;;  %s22_s19 = sadd.s32 1, %s1112_s19   ;;  %s1462_s11 = sld [smem:[#allocation18_spill]] }
 0x41e   : > { %p19_p2 = scmp.ge.s32.totalorder %s22_s19, 10   ;;  %s1463_s15 = sld [smem:[#allocation13_spill]] }
 0x41f   : > { %s1464_s16 = sld [smem:[#allocation14_spill]]  ;;  %s1467_s12 = smov %s1088_s13 }
 0x420   : > { %s1465_s17 = sld [smem:[#allocation16_spill]]  ;;  %s1468_s13 = smov %s1092_s14 }
 0x421   : > { %s1466_s18 = sld [smem:[#allocation17_spill]]  ;;  %21 = sbr.rel (!%p19_p2) target bundleno = 11 (0xb), region = 101 }
 0x423   : > { %s1469_s14 = smov %s1462_s11 }
 0x426   :  { %680 = vsyncpa [#allocation3], 1 }
 0x427   :  { %682 = vsyncpa [#allocation3 + $0x1], 1 }
 0x428   :  { %683 = vsyncpa [#allocation6], 1 }
 0x429   :  { %685 = vsyncpa [#allocation6 + $0x1], 1 }
 0x42a   :  { %686 = vsyncpa [#allocation4], 1 }
 0x42b   :  { %688 = vsyncpa [#allocation4 + $0x1], 1 }

</bundles_post_ra>
